<compile_context>
chip_gen: v6e
topology: v6e:2x2x1
jax: 0.10.0
libtpu: 0.0.40
codegen_flags: <defaults>
</compile_context>

<pallas_src>
import functools

import jax
import jax.numpy as jnp
from jax import lax
from jax.experimental import pallas as pl
from jax.experimental.pallas import tpu as pltpu


# ----------------------------------------------------------------------------
# Fused kernel: avg/max pooling (reduction over spatial lane-tiles) + shared
# MLP + sigmoid, all in one pallas_call.
# ----------------------------------------------------------------------------
def _channel_attention_kernel(x_ref, w1_ref, w2_ref, o_ref, sum_ref, max_ref,
                              *, s_valid, tile_s, ragged):
    s = pl.program_id(1)
    ns = pl.num_programs(1)

    @pl.when(s == 0)
    def _init():
        sum_ref[...] = jnp.zeros_like(sum_ref)
        max_ref[...] = jnp.full_like(max_ref, -jnp.inf)

    xb = x_ref[0].astype(jnp.float32)          # (C, tile_s), channels on sublanes
    lane = sum_ref.shape[-1]                   # per-lane-chunk accumulation width
    n_chunks = tile_s // lane

    def accumulate(xs, xm):
        # Pure VPU adds/max into the (C, lane) partials.  Lane-aligned static
        # slices of xb are just vreg subsets — no relayout, no XLU per step.
        for i in range(n_chunks):
            lo = i * lane
            sum_ref[...] = sum_ref[...] + xs[:, lo:lo + lane]
            max_ref[...] = jnp.maximum(max_ref[...], xm[:, lo:lo + lane])

    if ragged:
        # Only the last spatial tile contains out-of-bounds columns, so only it
        # pays for the iota + masks.
        @pl.when(s != ns - 1)
        def _steady():
            accumulate(xb, xb)

        @pl.when(s == ns - 1)
        def _last():
            col = lax.broadcasted_iota(jnp.int32, xb.shape, 1)
            valid = (s * tile_s + col) < s_valid
            accumulate(jnp.where(valid, xb, 0.0),
                       jnp.where(valid, xb, -jnp.inf))
    else:
        accumulate(xb, xb)

    @pl.when(s == ns - 1)
    def _finalize():
        # Single cross-lane (XLU) reduce of the partials, once per batch elem.
        avg = jnp.sum(sum_ref[...], axis=1, keepdims=True) * (1.0 / float(s_valid))  # (C,1)
        mx = jnp.max(max_ref[...], axis=1, keepdims=True)                            # (C,1)

        def mlp(v):                                         # v: (C, 1)
            h = jnp.maximum(
                jnp.dot(w1_ref[...], v, preferred_element_type=jnp.float32), 0.0)    # (Ch,1)
            return jnp.dot(w2_ref[...], h, preferred_element_type=jnp.float32)       # (C,1)

        z = mlp(avg) + mlp(mx)
        o_ref[0] = (1.0 / (1.0 + jnp.exp(-z))).astype(o_ref.dtype)


def _choose_tile_s(S, C, itemsize, cap_bytes=(4 << 20)):
    """Spatial lane tile: multiple of 128 (or the full extent), <= ~4 MiB/block."""
    # Whole spatial extent fits in one block -> single spatial step, no mask.
    if C * S * itemsize <= cap_bytes:
        return S
    max_tile = max(128, ((cap_bytes // (itemsize * C)) // 128) * 128)
    if S < 128:
        return S
    tile = min(max_tile, (S // 128) * 128)
    if S % tile == 0:
        return tile
    # Prefer an exact multiple-of-128 divisor (no ragged last tile) as long as
    # it does not shrink the tile by more than 2x.
    d = tile
    while d >= max(128, tile // 2):
        if S % d == 0:
            return d
        d -= 128
    return tile  # ragged last tile -> masked in-kernel, NO HBM pad copy


def channel_attention_forward(x_nchw, params):
    B, C, H, W = x_nchw.shape
    S = H * W
    w1 = params["w1"].astype(jnp.float32)      # (Ch, C)  -- torch conv1 weight layout
    w2 = params["w2"].astype(jnp.float32)      # (C, Ch)  -- torch conv2 weight layout
    Ch = w1.shape[0]

    # Free reshape of contiguous NCHW: spatial flattened onto the lane axis.
    x = x_nchw.reshape(B, C, S)

    itemsize = jnp.dtype(x.dtype).itemsize
    tile_s = _choose_tile_s(S, C, itemsize)
    ragged = (S % tile_s) != 0
    num_s = pl.cdiv(S, tile_s)
    lane_acc = 128 if tile_s % 128 == 0 else tile_s

    out = pl.pallas_call(
        functools.partial(_channel_attention_kernel,
                          s_valid=S, tile_s=tile_s, ragged=ragged),
        out_shape=jax.ShapeDtypeStruct((B, C, 1), jnp.float32),
        grid=(B, num_s),
        in_specs=[
            pl.BlockSpec((1, C, tile_s), lambda b, s: (b, 0, s)),
            pl.BlockSpec((Ch, C), lambda b, s: (0, 0)),
            pl.BlockSpec((C, Ch), lambda b, s: (0, 0)),
        ],
        out_specs=pl.BlockSpec((1, C, 1), lambda b, s: (b, 0, 0)),
        scratch_shapes=[pltpu.VMEM((C, lane_acc), jnp.float32),   # running sum partials
                        pltpu.VMEM((C, lane_acc), jnp.float32)],  # running max partials
        compiler_params=pltpu.CompilerParams(
            dimension_semantics=("parallel", "arbitrary"),
            vmem_limit_bytes=32 * 1024 * 1024),
    )(x, w1, w2)

    return out.reshape(B, C, 1, 1)


# ----------------------------------------------------------------------------
# Parameters in the native PyTorch Conv2d(1x1, bias=False) layout:
#   conv1.weight -> (C//ratio, C),  conv2.weight -> (C, C//ratio)
# PyTorch default init: U(-1/sqrt(fan_in), 1/sqrt(fan_in)).
# ----------------------------------------------------------------------------
def init_params(key, in_planes, ratio=4):
    hidden = max(in_planes // ratio, 1)
    k1, k2 = jax.random.split(key)
    b1 = 1.0 / jnp.sqrt(float(in_planes))
    b2 = 1.0 / jnp.sqrt(float(hidden))
    w1 = jax.random.uniform(k1, (hidden, in_planes), jnp.float32, -b1, b1)
    w2 = jax.random.uniform(k2, (in_planes, hidden), jnp.float32, -b2, b2)
    return {"w1": w1, "w2": w2}


def _reference(x_nchw, params):
    w1, w2 = params["w1"], params["w2"]               # (Ch, C), (C, Ch)
    avg = jnp.mean(x_nchw, axis=(2, 3))               # (B, C)
    mx = jnp.max(x_nchw, axis=(2, 3))                 # (B, C)

    def mlp(v):
        return jnp.maximum(v @ w1.T, 0.0) @ w2.T

    z = mlp(avg) + mlp(mx)
    return (1.0 / (1.0 + jnp.exp(-z))).reshape(x_nchw.shape[0], -1, 1, 1)


if __name__ == "__main__":
    B, C, H, W = 2, 32, 16, 16
    ratio = 4

    key = jax.random.PRNGKey(0)
    kx, kp = jax.random.split(key)
    x = jax.random.normal(kx, (B, C, H, W), jnp.float32)
    params = init_params(kp, in_planes=C, ratio=ratio)

    fwd = jax.jit(channel_attention_forward)
    out = jax.block_until_ready(fwd(x, params))

    assert out.shape == (B, C, 1, 1), out.shape
    assert bool(jnp.all(jnp.isfinite(out)))

    ref = _reference(x, params)
    assert bool(jnp.allclose(out, ref, atol=1e-4, rtol=1e-4)), \
        float(jnp.max(jnp.abs(out - ref)))

    print("KERNEL_OK")
</pallas_src>

<mosaic_0001>
module attributes {stable_mosaic.version = 11 : i64} {
  func.func @_channel_attention_kernel(%arg0: i32, %arg1: i32, %arg2: memref<1x32x256xf32, #tpu.memory_space<vmem>>, %arg3: memref<8x32xf32, #tpu.memory_space<vmem>>, %arg4: memref<32x8xf32, #tpu.memory_space<vmem>>, %arg5: memref<1x32x1xf32, #tpu.memory_space<vmem>>, %arg6: memref<32x128xf32, #tpu.memory_space<vmem>>, %arg7: memref<32x128xf32, #tpu.memory_space<vmem>>) attributes {dimension_semantics = [#tpu.dimension_semantics<parallel>, #tpu.dimension_semantics<arbitrary>], iteration_bounds = array<i64: 2, 1>, scalar_prefetch = 0 : i64, scratch_operands = 2 : i64, tpu.core_type = #tpu.core_type<tc>, window_params = [{transform_indices = @transform_0, window_bounds = array<i64: 1, 32, 256>}, {pipeline_mode = #tpu.pipeline_mode<synchronous>, transform_indices = @transform_1, window_bounds = array<i64: 8, 32>}, {pipeline_mode = #tpu.pipeline_mode<synchronous>, transform_indices = @transform_2, window_bounds = array<i64: 32, 8>}, {transform_indices = @transform_3, window_bounds = array<i64: 1, 32, 1>}]} {
    %c0_i32 = arith.constant 0 : i32
    %0 = arith.cmpi eq, %arg1, %c0_i32 : i32
    %1 = arith.extui %0 : i1 to i32
    %c0_i32_0 = arith.constant 0 : i32
    %2 = arith.cmpi ne, %1, %c0_i32_0 : i32
    scf.if %2 {
      %cst = arith.constant 0.000000e+00 : f32
      %24 = vector.broadcast %cst : f32 to vector<32x128xf32>
      %c0_21 = arith.constant 0 : index
      %c0_22 = arith.constant 0 : index
      %25 = vector.load %arg6[%c0_21, %c0_22] : memref<32x128xf32, #tpu.memory_space<vmem>>, vector<32x128xf32>
      tpu.vector_store %arg6[%c0_21, %c0_22], %24 {strides = array<i32>} : memref<32x128xf32, #tpu.memory_space<vmem>>, vector<32x128xf32>,
      %cst_23 = arith.constant 0xFF800000 : f32
      %26 = vector.broadcast %cst_23 : f32 to vector<32x128xf32>
      %c0_24 = arith.constant 0 : index
      %c0_25 = arith.constant 0 : index
      %27 = vector.load %arg7[%c0_24, %c0_25] : memref<32x128xf32, #tpu.memory_space<vmem>>, vector<32x128xf32>
      tpu.vector_store %arg7[%c0_24, %c0_25], %26 {strides = array<i32>} : memref<32x128xf32, #tpu.memory_space<vmem>>, vector<32x128xf32>,
    } else {
    }
    %c0 = arith.constant 0 : index
    %c0_1 = arith.constant 0 : index
    %c0_2 = arith.constant 0 : index
    %3 = vector.load %arg2[%c0, %c0_1, %c0_2] : memref<1x32x256xf32, #tpu.memory_space<vmem>>, vector<1x32x256xf32>
    %4 = vector.shape_cast %3 : vector<1x32x256xf32> to vector<32x256xf32>
    %c0_3 = arith.constant 0 : index
    %c0_4 = arith.constant 0 : index
    %5 = vector.load %arg6[%c0_3, %c0_4] : memref<32x128xf32, #tpu.memory_space<vmem>>, vector<32x128xf32>
    %6 = vector.extract_strided_slice %4 {offsets = [0, 0], sizes = [32, 128], strides = [1, 1]} : vector<32x256xf32> to vector<32x128xf32>
    %7 = arith.addf %5, %6 : vector<32x128xf32>
    %c0_5 = arith.constant 0 : index
    %c0_6 = arith.constant 0 : index
    %8 = vector.load %arg6[%c0_5, %c0_6] : memref<32x128xf32, #tpu.memory_space<vmem>>, vector<32x128xf32>
    tpu.vector_store %arg6[%c0_5, %c0_6], %7 {strides = array<i32>} : memref<32x128xf32, #tpu.memory_space<vmem>>, vector<32x128xf32>,
    %c0_7 = arith.constant 0 : index
    %c0_8 = arith.constant 0 : index
    %9 = vector.load %arg7[%c0_7, %c0_8] : memref<32x128xf32, #tpu.memory_space<vmem>>, vector<32x128xf32>
    %10 = vector.extract_strided_slice %4 {offsets = [0, 0], sizes = [32, 128], strides = [1, 1]} : vector<32x256xf32> to vector<32x128xf32>
    %11 = arith.maximumf %9, %10 : vector<32x128xf32>
    %c0_9 = arith.constant 0 : index
    %c0_10 = arith.constant 0 : index
    %12 = vector.load %arg7[%c0_9, %c0_10] : memref<32x128xf32, #tpu.memory_space<vmem>>, vector<32x128xf32>
    tpu.vector_store %arg7[%c0_9, %c0_10], %11 {strides = array<i32>} : memref<32x128xf32, #tpu.memory_space<vmem>>, vector<32x128xf32>,
    %c0_11 = arith.constant 0 : index
    %c0_12 = arith.constant 0 : index
    %13 = vector.load %arg6[%c0_11, %c0_12] : memref<32x128xf32, #tpu.memory_space<vmem>>, vector<32x128xf32>
    %14 = vector.extract_strided_slice %4 {offsets = [0, 128], sizes = [32, 128], strides = [1, 1]} : vector<32x256xf32> to vector<32x128xf32>
    %15 = arith.addf %13, %14 : vector<32x128xf32>
    %c0_13 = arith.constant 0 : index
    %c0_14 = arith.constant 0 : index
    %16 = vector.load %arg6[%c0_13, %c0_14] : memref<32x128xf32, #tpu.memory_space<vmem>>, vector<32x128xf32>
    tpu.vector_store %arg6[%c0_13, %c0_14], %15 {strides = array<i32>} : memref<32x128xf32, #tpu.memory_space<vmem>>, vector<32x128xf32>,
    %c0_15 = arith.constant 0 : index
    %c0_16 = arith.constant 0 : index
    %17 = vector.load %arg7[%c0_15, %c0_16] : memref<32x128xf32, #tpu.memory_space<vmem>>, vector<32x128xf32>
    %18 = vector.extract_strided_slice %4 {offsets = [0, 128], sizes = [32, 128], strides = [1, 1]} : vector<32x256xf32> to vector<32x128xf32>
    %19 = arith.maximumf %17, %18 : vector<32x128xf32>
    %c0_17 = arith.constant 0 : index
    %c0_18 = arith.constant 0 : index
    %20 = vector.load %arg7[%c0_17, %c0_18] : memref<32x128xf32, #tpu.memory_space<vmem>>, vector<32x128xf32>
    tpu.vector_store %arg7[%c0_17, %c0_18], %19 {strides = array<i32>} : memref<32x128xf32, #tpu.memory_space<vmem>>, vector<32x128xf32>,
    %c0_i32_19 = arith.constant 0 : i32
    %21 = arith.cmpi eq, %arg1, %c0_i32_19 : i32
    %22 = arith.extui %21 : i1 to i32
    %c0_i32_20 = arith.constant 0 : i32
    %23 = arith.cmpi ne, %22, %c0_i32_20 : i32
    scf.if %23 {
      %c0_21 = arith.constant 0 : index
      %c0_22 = arith.constant 0 : index
      %24 = vector.load %arg6[%c0_21, %c0_22] : memref<32x128xf32, #tpu.memory_space<vmem>>, vector<32x128xf32>
      %cst = arith.constant dense<0.000000e+00> : vector<32xf32>
      %25 = vector.multi_reduction <add>, %24, %cst [1] : vector<32x128xf32> to vector<32xf32>
      %26 = vector.shape_cast %25 : vector<32xf32> to vector<32x1xf32>
      %cst_23 = arith.constant 3.906250e-03 : f32
      %27 = vector.broadcast %cst_23 : f32 to vector<32x1xf32>
      %28 = arith.mulf %26, %27 : vector<32x1xf32>
      %c0_24 = arith.constant 0 : index
      %c0_25 = arith.constant 0 : index
      %29 = vector.load %arg7[%c0_24, %c0_25] : memref<32x128xf32, #tpu.memory_space<vmem>>, vector<32x128xf32>
      %cst_26 = arith.constant dense<0xFF800000> : vector<32xf32>
      %30 = vector.multi_reduction <maximumf>, %29, %cst_26 [1] : vector<32x128xf32> to vector<32xf32>
      %31 = vector.shape_cast %30 : vector<32xf32> to vector<32x1xf32>
      %c0_27 = arith.constant 0 : index
      %c0_28 = arith.constant 0 : index
      %32 = vector.load %arg3[%c0_27, %c0_28] : memref<8x32xf32, #tpu.memory_space<vmem>>, vector<8x32xf32>
      %cst_29 = arith.constant dense<0.000000e+00> : vector<8x1xf32>
      %33 = tpu.matmul %32, %28, %cst_29 {dimension_numbers = #tpu.dot_dimension_numbers<[1], [0], [0], [1], [0, 0, 1, 1], [], []>} : vector<8x32xf32>, vector<32x1xf32>, vector<8x1xf32> -> vector<8x1xf32>
      %cst_30 = arith.constant 0.000000e+00 : f32
      %34 = vector.broadcast %cst_30 : f32 to vector<8x1xf32>
      %35 = arith.maximumf %33, %34 : vector<8x1xf32>
      %c0_31 = arith.constant 0 : index
      %c0_32 = arith.constant 0 : index
      %36 = vector.load %arg4[%c0_31, %c0_32] : memref<32x8xf32, #tpu.memory_space<vmem>>, vector<32x8xf32>
      %cst_33 = arith.constant dense<0.000000e+00> : vector<32x1xf32>
      %37 = tpu.matmul %36, %35, %cst_33 {dimension_numbers = #tpu.dot_dimension_numbers<[1], [0], [0], [1], [0, 0, 1, 1], [], []>} : vector<32x8xf32>, vector<8x1xf32>, vector<32x1xf32> -> vector<32x1xf32>
      %c0_34 = arith.constant 0 : index
      %c0_35 = arith.constant 0 : index
      %38 = vector.load %arg3[%c0_34, %c0_35] : memref<8x32xf32, #tpu.memory_space<vmem>>, vector<8x32xf32>
      %cst_36 = arith.constant dense<0.000000e+00> : vector<8x1xf32>
      %39 = tpu.matmul %38, %31, %cst_36 {dimension_numbers = #tpu.dot_dimension_numbers<[1], [0], [0], [1], [0, 0, 1, 1], [], []>} : vector<8x32xf32>, vector<32x1xf32>, vector<8x1xf32> -> vector<8x1xf32>
      %cst_37 = arith.constant 0.000000e+00 : f32
      %40 = vector.broadcast %cst_37 : f32 to vector<8x1xf32>
      %41 = arith.maximumf %39, %40 : vector<8x1xf32>
      %c0_38 = arith.constant 0 : index
      %c0_39 = arith.constant 0 : index
      %42 = vector.load %arg4[%c0_38, %c0_39] : memref<32x8xf32, #tpu.memory_space<vmem>>, vector<32x8xf32>
      %cst_40 = arith.constant dense<0.000000e+00> : vector<32x1xf32>
      %43 = tpu.matmul %42, %41, %cst_40 {dimension_numbers = #tpu.dot_dimension_numbers<[1], [0], [0], [1], [0, 0, 1, 1], [], []>} : vector<32x8xf32>, vector<8x1xf32>, vector<32x1xf32> -> vector<32x1xf32>
      %44 = arith.addf %37, %43 : vector<32x1xf32>
      %cst_41 = arith.constant 0.000000e+00 : f32
      %45 = vector.broadcast %cst_41 : f32 to vector<32x1xf32>
      %46 = arith.subf %45, %44 : vector<32x1xf32>
      %47 = math.exp %46 : vector<32x1xf32>
      %cst_42 = arith.constant 1.000000e+00 : f32
      %48 = vector.broadcast %cst_42 : f32 to vector<32x1xf32>
      %49 = arith.addf %48, %47 : vector<32x1xf32>
      %cst_43 = arith.constant 1.000000e+00 : f32
      %50 = vector.broadcast %cst_43 : f32 to vector<32x1xf32>
      %51 = arith.divf %50, %49 : vector<32x1xf32>
      %c0_44 = arith.constant 0 : index
      %c0_45 = arith.constant 0 : index
      %c0_46 = arith.constant 0 : index
      %52 = vector.load %arg5[%c0_44, %c0_45, %c0_46] : memref<1x32x1xf32, #tpu.memory_space<vmem>>, vector<1x32x1xf32>
      %53 = vector.shape_cast %52 : vector<1x32x1xf32> to vector<32x1xf32>
      %54 = vector.shape_cast %51 : vector<32x1xf32> to vector<1x32x1xf32>
      tpu.vector_store %arg5[%c0_44, %c0_45, %c0_46], %54 {strides = array<i32>} : memref<1x32x1xf32, #tpu.memory_space<vmem>>, vector<1x32x1xf32>,
    } else {
    }
    return
  }
  func.func @transform_0(%arg0: i32, %arg1: i32) -> (i32, i32, i32) {
    %c0_i32 = arith.constant 0 : i32
    %c0_i32_0 = arith.constant 0 : i32
    return %arg0, %c0_i32, %arg1 : i32, i32, i32
  }
  func.func @transform_1(%arg0: i32, %arg1: i32) -> (i32, i32) {
    %c0_i32 = arith.constant 0 : i32
    %c0_i32_0 = arith.constant 0 : i32
    %c0_i32_1 = arith.constant 0 : i32
    return %c0_i32, %c0_i32_0 : i32, i32
  }
  func.func @transform_2(%arg0: i32, %arg1: i32) -> (i32, i32) {
    %c0_i32 = arith.constant 0 : i32
    %c0_i32_0 = arith.constant 0 : i32
    %c0_i32_1 = arith.constant 0 : i32
    return %c0_i32, %c0_i32_0 : i32, i32
  }
  func.func @transform_3(%arg0: i32, %arg1: i32) -> (i32, i32, i32) {
    %c0_i32 = arith.constant 0 : i32
    %c0_i32_0 = arith.constant 0 : i32
    %c0_i32_1 = arith.constant 0 : i32
    return %arg0, %c0_i32, %c0_i32_0 : i32, i32, i32
  }
}

</mosaic_0001>

<bundles_post_ra>
// kernel: channel_attention_forward.1
= control target key start
LH: loop header
LB: loop body
LE: loop exit
PB: predicated region body
PF: predicated region fallthrough
CT: control target
= control target key end

     0   :  { %s899_s12 = smov 0   ;;  %s901_s13 = smov 0   ;;  %s959_s0 = inlined_call_operand.vmem [shape: f32[2,32,256], index: 0, kind: input, shape index: {}]   ;;  %s960_s1 = inlined_call_operand.vmem [shape: f32[8,32], index: 1, kind: input, shape index: {}]   ;;  %s961_s2 = inlined_call_operand.vmem [shape: f32[32,8], index: 2, kind: input, shape index: {}]   ;;  %s962_s3 = inlined_call_operand.vmem [shape: f32[2,32,1], index: 3, kind: output, shape index: {}]  }
   0x1   :  { %s903_s14 = smov 0  }
   0x2 LB: > { %s25_s15 = sadd.s32 1, %s871_s13  ;;  %p734_p0 = scmp.ge.s32.totalorder %s875_s14, 1  ;;  %s875_s14 = sphi %s903_s14, %s13_s14   ;;  %s871_s13 = sphi %s901_s13, %s964_s13   ;;  %s867_s12 = sphi %s899_s12, %s963_s12  }
   0x3   : > { %p27_p1 = scmp.ge.s32.totalorder %s25_s15, 2  ;;  %p156_p2 = scmp.lt.s32.totalorder %s875_s14, 3 }
   0x5   : > { %s966_s15 = smov (%p27_p1, %s25_s15), 0  ;;  %p157_p3 = pnand %p734_p0, %p156_p2 }
   0x6   : > { %p185_p4 = scmp.lt.s32.totalorder (!%p157_p3), %s867_s12, 1 }
   0x7   : > { %160 = sbr.rel (%p157_p3) target bundleno = 604 (0x25c), region = 32 }
   0xc   : > { %s968_s12 = smov (!%p185_p4, %s867_s12), 1  ;;  %v877_v16 = vmov 0.0   ;;  %vm878_vm0 = vmmov 0   ;;  %v298_v27 = vld [vmem:[%s960_s1] sm:$0xff]  ;;  %vm299_vm1 = vcmask 261120   ;;  %vm449_vm2 = vcmask 64512  }
   0xd   : > { %s751_s16 = sshll.u32 %s968_s12, 6  ;;  %773 = vmatprep.subr.mxu0 %v877_v16  ;;  %784 = vmatprep.subr.mxu1 %v877_v16  ;;  %v374_v30 = vld [vmem:[%s961_s2] sm:$0xff]  ;;  %v375_v34 = vld [vmem:[%s961_s2 + $0x8] sm:$0xff]  ;;  %v376_v35 = vld [vmem:[%s961_s2 + $0x10] sm:$0xff]  ;;  %s752_s30 = sshll.u32 %s968_s12, 5  ;;  %vm656_vm3 = vcmask 7168  }
   0xe   : > { %s192_s19 = scalar_lea.vmem %s959_s0, %s751_s16  ;;  %781 = vmatprep.mubr.msk.f32.mxu0 %vm878_vm0, %v877_v16  ;;  %792 = vmatprep.mubr.msk.f32.mxu1 %vm878_vm0, %v877_v16  ;;  %v377_v39 = vld [vmem:[%s961_s2 + $0x18] sm:$0xff]  ;;  %s198_s6 = scalar_lea.vmem %s962_s3, %s752_s30 }
   0xf   : > { %v217_v0 = vld [vmem:[%s192_s19 + $0x30] sm:$0xff]  ;;  %v218_v1 = vld [vmem:[%s192_s19 + $0x38] sm:$0xff]  ;;  %v215_v2 = vld [vmem:[%s192_s19 + $0x20] sm:$0xff] }
  0x10   : > { %v250_v3 = vadd.f32 %v218_v1, %v217_v0  ;;  %v262_v4 = vmax.f32 %v217_v0, %v218_v1  ;;  %v216_v5 = vld [vmem:[%s192_s19 + $0x28] sm:$0xff]  ;;  %v213_v6 = vld [vmem:[%s192_s19 + $0x10] sm:$0xff]  ;;  %v214_v7 = vld [vmem:[%s192_s19 + $0x18] sm:$0xff] }
  0x11   : > { %v249_v8 = vadd.f32 %v216_v5, %v215_v2  ;;  %v248_v9 = vadd.f32 %v214_v7, %v213_v6  ;;  %v211_v10 = vld [vmem:[%s192_s19] sm:$0xff]  ;;  %v212_v11 = vld [vmem:[%s192_s19 + $0x8] sm:$0xff]  ;;  %v261_v12 = vmax.f32 %v215_v2, %v216_v5  ;;  %v260_v14 = vmax.f32 %v213_v6, %v214_v7 }
  0x12   : > { %280 = vadd.xlane.f32.xlu0 %v250_v3  ;;  %296 = vmax.xlane.f32.xlu1 %v262_v4  ;;  %v247_v13 = vadd.f32 %v212_v11, %v211_v10  ;;  %v259_v15 = vmax.f32 %v211_v10, %v212_v11 }
  0x16   : > { %278 = vadd.xlane.f32.xlu0 %v249_v8  ;;  %276 = vadd.xlane.f32.xlu1 %v248_v9 }
  0x1a   : > { %294 = vmax.xlane.f32.xlu0 %v261_v12  ;;  %274 = vadd.xlane.f32.xlu1 %v247_v13 }
  0x1e   : > { %292 = vmax.xlane.f32.xlu0 %v260_v14  ;;  %290 = vmax.xlane.f32.xlu1 %v259_v15 }
  0x9b   : > { %v281_v17 = vpop.xlane.xlu0 %280  ;;  %v297_v18 = vpop.xlane.xlu1 %296 }
  0x9c   : > { %v285_v19 = vmul.f32 0.00390625, %v281_v17  ;;  %785 = vmatpush3.msra.mxu1 %v297_v18 }
  0x9d   : > { %786 = vmatprep.subr.mxu1 %v877_v16 }
  0x9e   : > { %774 = vmatpush3.msra.mxu0 %v285_v19 }
  0x9f   : > { %v279_v20 = vpop.xlane.xlu0 %278  ;;  %775 = vmatprep.subr.mxu0 %v877_v16  ;;  %v277_v21 = vpop.xlane.xlu1 %276 }
  0xa0   : > { %v284_v22 = vmul.f32 0.00390625, %v279_v20  ;;  %v283_v23 = vmul.f32 0.00390625, %v277_v21 }
  0xa2   : > { %776 = vmatpush3.msra.mxu0 %v284_v22 }
  0xa3   : > { %777 = vmatprep.subr.mxu0 %v877_v16  ;;  %v295_v24 = vpop.xlane.xlu0 %294  ;;  %v275_v25 = vpop.xlane.xlu1 %274 }
  0xa4   : > { %778 = vmatpush3.msra.mxu0 %v283_v23  ;;  %787 = vmatpush3.msra.mxu1 %v295_v24  ;;  %v282_v26 = vmul.f32 0.00390625, %v275_v25 }
  0xa5   : > { %788 = vmatprep.subr.mxu1 %v877_v16  ;;  %779 = vmatprep.subr.mxu0 %v877_v16 }
  0xa6   : > { %780 = vmatpush3.msra.mxu0 %v282_v26 }
  0xa7   : > { %v293_v28 = vpop.xlane.xlu0 %292  ;;  %782 = vmatmul.mubr.msk.f32.vlgmr.msra.gmra.mxu0 %vm299_vm1, %v298_v27  ;;  %v291_v29 = vpop.xlane.xlu1 %290 }
  0xa8   : > { %789 = vmatpush3.msra.mxu1 %v293_v28  ;;  %797 = vmatprep.mubr.msk.f32.mxu0 %vm449_vm2, %v374_v30 }
  0xa9   : > { %790 = vmatprep.subr.mxu1 %v877_v16 }
  0xaa   : > { %791 = vmatpush3.msra.mxu1 %v291_v29 }
  0xab   : > { %793 = vmatmul.mubr.msk.f32.vlgmr.msra.gmra.mxu1 %vm299_vm1, %v298_v27 }
  0xac   : > { %805 = vmatprep.mubr.msk.f32.mxu1 %vm449_vm2, %v374_v30 }
 0x167   : > { %v369_v31 = vpop.f32.mrf.mxu0 }
 0x168   : > { %v373_v32 = vmax.f32 %v369_v31, 0.0 }
 0x169   : > { %v783_v33 = vpop.f32.mrf.mxu0 }
 0x16a   : > { %803 = vmatprep.subr.mxu1 %v373_v32 }
 0x16b   : > { %v444_v36 = vpop.f32.mrf.mxu1  ;;  %804 = vmatpush3.msra.mxu1 %v373_v32 }
 0x16c   : > { %v448_v37 = vmax.f32 %v444_v36, 0.0  ;;  %806 = vmatmul.mubr.msk.f32.vlgmr.msra.gmra.mxu1 %vm449_vm2, %v375_v34 }
 0x16d   : > { %v794_v38 = vpop.f32.mrf.mxu1  ;;  %808 = vmatprep.mubr.msk.f32.mxu1 %vm449_vm2, %v376_v35 }
 0x16e   : > { %795 = vmatprep.subr.mxu0 %v448_v37 }
 0x16f   : > { %796 = vmatpush3.msra.mxu0 %v448_v37 }
 0x170   : > { %798 = vmatmul.mubr.msk.f32.vlgmr.msra.gmra.mxu0 %vm449_vm2, %v375_v34  ;;  %809 = vmatmul.mubr.msk.f32.gmra.mxu1 %vm449_vm2, %v377_v39 }
 0x171   : > { %800 = vmatprep.mubr.msk.f32.mxu0 %vm449_vm2, %v376_v35 }
 0x174   : > { %801 = vmatmul.mubr.msk.f32.gmra.mxu0 %vm449_vm2, %v377_v39 }
 0x22c   : > { %v807_v40 = vpop.f32.mrf.mxu1 }
 0x22e   : > { %v613_v41 = vpop.f32.mrf.mxu1 }
 0x230   : > { %v799_v42 = vpop.f32.mrf.mxu0  ;;  %v810_v45 = vpop.f32.mrf.mxu1 }
 0x231   : > { %v619_v43 = vadd.f32 %v807_v40, %v799_v42 }
 0x232   : > { %v528_v44 = vpop.f32.mrf.mxu0  ;;  %v623_v53 = vpop.f32.mrf.mxu1 }
 0x233   : > { %v633_v46 = vsub.f32 0.0, %v619_v43  ;;  %v614_v47 = vadd.f32 %v613_v41, %v528_v44 }
 0x234   : > { %v802_v48 = vpop.f32.mrf.mxu0 }
 0x235   : > { %v638_v49 = vmul.f32 1.442695, %v633_v46  ;;  %v632_v50 = vsub.f32 0.0, %v614_v47  ;;  %v629_v51 = vadd.f32 %v810_v45, %v802_v48 }
 0x236   : > { %v538_v52 = vpop.f32.mrf.mxu0 }
 0x237   : > { %837 = vpow2.f32 %v638_v49  ;;  %v636_v54 = vmul.f32 1.442695, %v632_v50  ;;  %v635_v55 = vsub.f32 0.0, %v629_v51  ;;  %v624_v56 = vadd.f32 %v623_v53, %v538_v52 }
 0x239   : > { %839 = vpow2.f32 %v636_v54  ;;  %v642_v57 = vmul.f32 1.442695, %v635_v55  ;;  %v634_v58 = vsub.f32 0.0, %v624_v56 }
 0x23b   : > { %841 = vpow2.f32 %v642_v57  ;;  %v640_v59 = vmul.f32 1.442695, %v634_v58 }
 0x23d   : > { %843 = vpow2.f32 %v640_v59 }
 0x244   : > { %v838_v60 = vpop.eup %837 }
 0x245   : > { %v645_v61 = vadd.f32 1.0, %v838_v60 }
 0x246   : > { %v840_v62 = vpop.eup %839 }
 0x247   : > { %845 = vrcp.f32 %v645_v61  ;;  %v644_v63 = vadd.f32 1.0, %v840_v62 }
 0x248   : > { %v842_v0 = vpop.eup %841 }
 0x249   : > { %847 = vrcp.f32 %v644_v63  ;;  %v647_v1 = vadd.f32 1.0, %v842_v0 }
 0x24a   : > { %v844_v2 = vpop.eup %843 }
 0x24b   : > { %849 = vrcp.f32 %v647_v1  ;;  %v646_v3 = vadd.f32 1.0, %v844_v2 }
 0x24d   : > { %851 = vrcp.f32 %v646_v3 }
 0x254   : > { %v846_v4 = vpop.eup %845 }
 0x255   : > { %658 = vst.msk [vmem:[%s198_s6 + $0x8] sm:$0xff] %vm656_vm3, %v846_v4 }
 0x256   : > { %v848_v5 = vpop.eup %847 }
 0x257   : > { %657 = vst.msk [vmem:[%s198_s6] sm:$0xff] %vm656_vm3, %v848_v5 }
 0x258   : > { %v850_v6 = vpop.eup %849 }
 0x259   : > { %660 = vst.msk [vmem:[%s198_s6 + $0x18] sm:$0xff] %vm656_vm3, %v850_v6 }
 0x25a   : > { %v852_v7 = vpop.eup %851 }
 0x25b   : > { %659 = vst.msk [vmem:[%s198_s6 + $0x10] sm:$0xff] %vm656_vm3, %v852_v7 }
 0x25c PF: > { %s13_s14 = sadd.s32 1, %s875_s14   ;;  %s963_s12 = smov %s871_s13 }
 0x25d   : > { %p10_p5 = scmp.ge.s32.totalorder %s13_s14, 4   ;;  %s964_s13 = smov %s966_s15 }
 0x25f   :  { %12 = sbr.rel (!%p10_p5) target bundleno = 2 (0x2), region = 70 }

</bundles_post_ra>
